<compile_context>
chip_gen: v5e
topology: v5e:2x2
jax: 0.10.0
libtpu: 0.0.40
codegen_flags: <defaults>
</compile_context>

<pallas_src>
import functools

import jax
import jax.numpy as jnp
from jax.experimental import pallas as pl
from jax.experimental.pallas import tpu as pltpu


def _round_up(x: int, m: int) -> int:
    return (x + m - 1) // m * m


def _vit_output_kernel(x_ref, w_ref, b_ref, res_ref, o_ref, acc_ref, *, compute_dtype):
    # x_ref:   (tm, tk)   flattened hidden_states tile
    # w_ref:   (tk, tn)   dense weight tile, (K, N) layout
    # b_ref:   (1,  tn)   dense bias tile
    # res_ref: (tm, tn)   residual (input_tensor) tile
    # o_ref:   (tm, tn)   output tile
    # acc_ref: (tm, tn)   f32 accumulator (VMEM scratch, resident across k)
    k = pl.program_id(2)

    @pl.when(k == 0)
    def _init():
        acc_ref[...] = jnp.zeros_like(acc_ref)

    x = x_ref[...]
    w = w_ref[...]
    if compute_dtype is not None:
        x = x.astype(compute_dtype)
        w = w.astype(compute_dtype)
    acc_ref[...] += jnp.dot(x, w, preferred_element_type=jnp.float32)

    @pl.when(k == pl.num_programs(2) - 1)
    def _finalize():
        # dropout (eval) and drop_path(0.0) are identities -> just bias + residual.
        y = acc_ref[...] + b_ref[...].astype(jnp.float32) + res_ref[...].astype(jnp.float32)
        o_ref[...] = y.astype(o_ref.dtype)


def vit_output(hidden_states, input_tensor, weight_kn, bias,
               *, tm=256, tn=256, tk=512, compute_dtype=None):
    """ViTOutput forward.

    hidden_states: [B, S, K]   (K = intermediate_size)
    input_tensor:  [B, S, N]   (N = hidden_size, residual)
    weight_kn:     [K, N]      dense weight, ALREADY transposed once at init
                               from the PyTorch nn.Linear [N, K] layout.
    bias:          [N]
    """
    B, S, K = hidden_states.shape
    N = input_tensor.shape[-1]
    assert weight_kn.shape == (K, N), weight_kn.shape
    M = B * S
    out_dtype = hidden_states.dtype

    x2d = hidden_states.reshape(M, K)
    r2d = input_tensor.reshape(M, N).astype(out_dtype)
    b2d = bias.reshape(1, N)
    w2d = weight_kn

    # Effective tiles: use the full dim when it fits in one tile (always legal
    # for BlockSpec); otherwise the requested (8,128)-aligned tile with the dim
    # padded up to a multiple of it.
    tm_e = M if M <= tm else tm
    tn_e = N if N <= tn else tn
    tk_e = K if K <= tk else tk
    Mp, Np, Kp = _round_up(M, tm_e), _round_up(N, tn_e), _round_up(K, tk_e)

    if (Mp, Kp) != (M, K):
        x2d = jnp.pad(x2d, ((0, Mp - M), (0, Kp - K)))
    if (Kp, Np) != (K, N):
        w2d = jnp.pad(w2d, ((0, Kp - K), (0, Np - N)))
    if Np != N:
        b2d = jnp.pad(b2d, ((0, 0), (0, Np - N)))
    if (Mp, Np) != (M, N):
        r2d = jnp.pad(r2d, ((0, Mp - M), (0, Np - N)))

    grid = (Mp // tm_e, Np // tn_e, Kp // tk_e)

    itemsize = jnp.dtype(out_dtype).itemsize
    cost = pl.CostEstimate(
        flops=2 * M * N * K,
        transcendentals=0,
        bytes_accessed=(x2d.size * x2d.dtype.itemsize
                        + w2d.size * w2d.dtype.itemsize
                        + b2d.size * b2d.dtype.itemsize
                        + r2d.size * r2d.dtype.itemsize
                        + Mp * Np * itemsize),
    )

    kernel = functools.partial(_vit_output_kernel, compute_dtype=compute_dtype)

    out2d = pl.pallas_call(
        kernel,
        out_shape=jax.ShapeDtypeStruct((Mp, Np), out_dtype),
        grid_spec=pltpu.PrefetchScalarGridSpec(
            num_scalar_prefetch=0,
            grid=grid,
            in_specs=[
                pl.BlockSpec((tm_e, tk_e), lambda i, j, k: (i, k)),   # x
                pl.BlockSpec((tk_e, tn_e), lambda i, j, k: (k, j)),   # w (K, N)
                pl.BlockSpec((1, tn_e), lambda i, j, k: (0, j)),      # bias
                pl.BlockSpec((tm_e, tn_e), lambda i, j, k: (i, j)),   # residual
            ],
            out_specs=pl.BlockSpec((tm_e, tn_e), lambda i, j, k: (i, j)),
            scratch_shapes=[pltpu.VMEM((tm_e, tn_e), jnp.float32)],
        ),
        # Residual is read once per (i, j) tile and dead afterwards -> reuse
        # its HBM buffer for the output.
        input_output_aliases={3: 0},
        cost_estimate=cost,
        compiler_params=pltpu.CompilerParams(
            dimension_semantics=("parallel", "parallel", "arbitrary"),
        ),
    )(x2d, w2d, b2d, r2d)

    return out2d[:M, :N].reshape(B, S, N)


if __name__ == "__main__":
    root = jax.random.PRNGKey(0)

    def run_case(case_id, B, S, K, N, tm, tn, tk, tol):
        k1, k2, k3, k4 = jax.random.split(jax.random.fold_in(root, case_id), 4)
        hidden_states = jax.random.normal(k1, (B, S, K), dtype=jnp.float32)
        input_tensor = jax.random.normal(k2, (B, S, N), dtype=jnp.float32)
        # PyTorch nn.Linear layout: W [out=N, in=K], b [N]
        weight = jax.random.normal(k3, (N, K), dtype=jnp.float32) * 0.02
        bias = jax.random.normal(k4, (N,), dtype=jnp.float32) * 0.02

        # One-time init-side transpose to (K, N); NOT done per forward call.
        weight_kn = jnp.asarray(weight.T)

        out = vit_output(hidden_states, input_tensor, weight_kn, bias,
                         tm=tm, tn=tn, tk=tk)
        jax.block_until_ready(out)

        ref = jnp.einsum("bsk,kn->bsn", hidden_states, weight_kn) + bias + input_tensor
        assert out.shape == (B, S, N)
        err = float(jnp.max(jnp.abs(out - ref)))
        assert jnp.allclose(out, ref, atol=tol, rtol=tol), f"max abs err {err}"

    # Small ViTOutput config (intermediate_size=64, hidden_size=32): single-tile grid.
    run_case(1, B=2, S=8, K=64, N=32, tm=256, tn=256, tk=512, tol=5e-3)
    # Multi-tile grid with padding: exercises K accumulation, pl.when init/epilogue,
    # and the (parallel, parallel, arbitrary) pipeline.
    run_case(2, B=2, S=100, K=384, N=192, tm=128, tn=128, tk=128, tol=5e-3)

    print("KERNEL_OK")
</pallas_src>

<mosaic_0001>
module attributes {stable_mosaic.version = 11 : i64} {
  func.func @_vit_output_kernel(%arg0: i32, %arg1: i32, %arg2: i32, %arg3: memref<16x64xf32, #tpu.memory_space<vmem>>, %arg4: memref<64x32xf32, #tpu.memory_space<vmem>>, %arg5: memref<1x32xf32, #tpu.memory_space<vmem>>, %arg6: memref<16x32xf32, #tpu.memory_space<vmem>>, %arg7: memref<16x32xf32, #tpu.memory_space<vmem>>, %arg8: memref<16x32xf32, #tpu.memory_space<vmem>>) attributes {dimension_semantics = [#tpu.dimension_semantics<parallel>, #tpu.dimension_semantics<parallel>, #tpu.dimension_semantics<arbitrary>], iteration_bounds = array<i64: 1, 1, 1>, scalar_prefetch = 0 : i64, scratch_operands = 1 : i64, tpu.core_type = #tpu.core_type<tc>, window_params = [{transform_indices = @transform_0, window_bounds = array<i64: 16, 64>}, {transform_indices = @transform_1, window_bounds = array<i64: 64, 32>}, {transform_indices = @transform_2, window_bounds = array<i64: 1, 32>}, {transform_indices = @transform_3, window_bounds = array<i64: 16, 32>}, {transform_indices = @transform_4, window_bounds = array<i64: 16, 32>}]} {
    %c0_i32 = arith.constant 0 : i32
    %0 = arith.cmpi eq, %arg2, %c0_i32 : i32
    %1 = arith.extui %0 : i1 to i32
    %c0_i32_0 = arith.constant 0 : i32
    %2 = arith.cmpi ne, %1, %c0_i32_0 : i32
    scf.if %2 {
      %cst_10 = arith.constant 0.000000e+00 : f32
      %12 = vector.broadcast %cst_10 : f32 to vector<16x32xf32>
      %c0_11 = arith.constant 0 : index
      %c0_12 = arith.constant 0 : index
      %13 = vector.load %arg8[%c0_11, %c0_12] : memref<16x32xf32, #tpu.memory_space<vmem>>, vector<16x32xf32>
      tpu.vector_store %arg8[%c0_11, %c0_12], %12 {strides = array<i32>} : memref<16x32xf32, #tpu.memory_space<vmem>>, vector<16x32xf32>,
    } else {
    }
    %c0 = arith.constant 0 : index
    %c0_1 = arith.constant 0 : index
    %3 = vector.load %arg3[%c0, %c0_1] : memref<16x64xf32, #tpu.memory_space<vmem>>, vector<16x64xf32>
    %c0_2 = arith.constant 0 : index
    %c0_3 = arith.constant 0 : index
    %4 = vector.load %arg4[%c0_2, %c0_3] : memref<64x32xf32, #tpu.memory_space<vmem>>, vector<64x32xf32>
    %c0_4 = arith.constant 0 : index
    %c0_5 = arith.constant 0 : index
    %5 = vector.load %arg8[%c0_4, %c0_5] : memref<16x32xf32, #tpu.memory_space<vmem>>, vector<16x32xf32>
    %cst = arith.constant dense<0.000000e+00> : vector<16x32xf32>
    %6 = tpu.matmul %3, %4, %cst {dimension_numbers = #tpu.dot_dimension_numbers<[1], [0], [0], [1], [0, 0, 1, 1], [], []>} : vector<16x64xf32>, vector<64x32xf32>, vector<16x32xf32> -> vector<16x32xf32>
    %7 = arith.addf %5, %6 : vector<16x32xf32>
    %c0_6 = arith.constant 0 : index
    %c0_7 = arith.constant 0 : index
    %8 = vector.load %arg8[%c0_6, %c0_7] : memref<16x32xf32, #tpu.memory_space<vmem>>, vector<16x32xf32>
    tpu.vector_store %arg8[%c0_6, %c0_7], %7 {strides = array<i32>} : memref<16x32xf32, #tpu.memory_space<vmem>>, vector<16x32xf32>,
    %c0_i32_8 = arith.constant 0 : i32
    %9 = arith.cmpi eq, %arg2, %c0_i32_8 : i32
    %10 = arith.extui %9 : i1 to i32
    %c0_i32_9 = arith.constant 0 : i32
    %11 = arith.cmpi ne, %10, %c0_i32_9 : i32
    scf.if %11 {
      %c0_10 = arith.constant 0 : index
      %c0_11 = arith.constant 0 : index
      %12 = vector.load %arg8[%c0_10, %c0_11] : memref<16x32xf32, #tpu.memory_space<vmem>>, vector<16x32xf32>
      %c0_12 = arith.constant 0 : index
      %c0_13 = arith.constant 0 : index
      %13 = vector.load %arg5[%c0_12, %c0_13] : memref<1x32xf32, #tpu.memory_space<vmem>>, vector<1x32xf32>
      %14 = vector.broadcast %13 : vector<1x32xf32> to vector<16x32xf32>
      %15 = arith.addf %12, %14 : vector<16x32xf32>
      %c0_14 = arith.constant 0 : index
      %c0_15 = arith.constant 0 : index
      %16 = vector.load %arg6[%c0_14, %c0_15] : memref<16x32xf32, #tpu.memory_space<vmem>>, vector<16x32xf32>
      %17 = arith.addf %15, %16 : vector<16x32xf32>
      %c0_16 = arith.constant 0 : index
      %c0_17 = arith.constant 0 : index
      %18 = vector.load %arg7[%c0_16, %c0_17] : memref<16x32xf32, #tpu.memory_space<vmem>>, vector<16x32xf32>
      tpu.vector_store %arg7[%c0_16, %c0_17], %17 {strides = array<i32>} : memref<16x32xf32, #tpu.memory_space<vmem>>, vector<16x32xf32>,
    } else {
    }
    return
  }
  func.func @transform_0(%arg0: i32, %arg1: i32, %arg2: i32) -> (i32, i32) {
    %c0_i32 = arith.constant 0 : i32
    return %arg0, %arg2 : i32, i32
  }
  func.func @transform_1(%arg0: i32, %arg1: i32, %arg2: i32) -> (i32, i32) {
    %c0_i32 = arith.constant 0 : i32
    return %arg2, %arg1 : i32, i32
  }
  func.func @transform_2(%arg0: i32, %arg1: i32, %arg2: i32) -> (i32, i32) {
    %c0_i32 = arith.constant 0 : i32
    %c0_i32_0 = arith.constant 0 : i32
    return %c0_i32, %arg1 : i32, i32
  }
  func.func @transform_3(%arg0: i32, %arg1: i32, %arg2: i32) -> (i32, i32) {
    %c0_i32 = arith.constant 0 : i32
    return %arg0, %arg1 : i32, i32
  }
  func.func @transform_4(%arg0: i32, %arg1: i32, %arg2: i32) -> (i32, i32) {
    %c0_i32 = arith.constant 0 : i32
    return %arg0, %arg1 : i32, i32
  }
}

</mosaic_0001>

<bundles_post_ra>
// kernel: tpu_custom_call.1
= control target key start
LH: loop header
LB: loop body
LE: loop exit
PB: predicated region body
PF: predicated region fallthrough
CT: control target
= control target key end

     0   :  { %9 = vsyncpa [#allocation4], 0  ;;  %s273_s0 = inlined_call_operand.vmem [shape: f32[16,64], index: 0, kind: input, shape index: {}]   ;;  %s274_s1 = inlined_call_operand.vmem [shape: f32[64,32], index: 1, kind: input, shape index: {}]   ;;  %s275_s2 = inlined_call_operand.vmem [shape: f32[1,32], index: 2, kind: input, shape index: {}]   ;;  %s276_s3 = inlined_call_operand.hbm [shape: f32[16,32], index: 3, kind: input, shape index: {}, may-alias: {3,4}]   ;;  %s277_s4 = inlined_call_operand.hbm [shape: f32[16,32], index: 4, kind: output, shape index: {}, may-alias: {3,4}]  }
   0x1   :  { %10 = vsyncpa [#allocation5], 0  ;;  %s21_s17 = sshll.u32 %s276_s3, 4  ;;  %s192_s18 = smov [#allocation3]   ;;  %s22_s17 = int_to_ptr.hbm [resolvable:$true] %s21_s17 }
   0x2   :  { %s23_s19 = sshll.u32 %s192_s18, 4  ;;  %s193_s20 = smov 128   ;;  %s24_s19 = int_to_ptr.vmem [resolvable:$true] %s23_s19 }
   0x3   :  { %s194_s21 = smov 8  }
   0x4   :  { %29 = dma.hbm_to_vmem [thread:$0]  %s22_s17, 256, %s24_s19, [#allocation4], %s193_s20, %s193_s20, %s194_s21  }
   0x5   :  { %188 = dma.done.wait [#allocation4], 256  }
   0x6   :  { %189 = vsyncadd [#allocation4], 4294967040  ;;  %vm38_vm0 = vcmask 261120   ;;  %v195_v0 = vmov 0.0   ;;  %v50_v1 = vld [vmem:[%s274_s1 + $0x38] sm:$0xff]  ;;  %v49_v2 = vld [vmem:[%s274_s1 + $0x30] sm:$0xff] }
   0x7   :  { %39 = vst.msk [vmem:[#allocation2] sm:$0xff] %vm38_vm0, %v195_v0  ;;  %68 = vmatpush.msra.mxu0 %v50_v1  ;;  %126 = vmatpush.msra.mxu1 %v50_v1  ;;  %v48_v3 = vld [vmem:[%s274_s1 + $0x28] sm:$0xff]  ;;  %v47_v4 = vld [vmem:[%s274_s1 + $0x20] sm:$0xff]  ;;  %v46_v5 = vld [vmem:[%s274_s1 + $0x18] sm:$0xff]  ;;  %vm53_vm1 = vcmask 523264   ;;  %s111_s19 = sshll.u32 %s277_s4, 4  ;;  %s112_s19 = int_to_ptr.hbm [resolvable:$true] %s111_s19 }
   0x8   :  { %40 = vst.msk [vmem:[#allocation2 + $0x8] sm:$0xff] %vm38_vm0, %v195_v0  ;;  %v45_v6 = vld [vmem:[%s274_s1 + $0x10] sm:$0xff]  ;;  %v44_v7 = vld [vmem:[%s274_s1 + $0x8] sm:$0xff]  ;;  %v43_v8 = vld [vmem:[%s274_s1] sm:$0xff] }
   0x9   :  { %69 = vmatpush.msra.mxu0 %v49_v2  ;;  %127 = vmatpush.msra.mxu1 %v49_v2  ;;  %v41_v9 = vld [vmem:[%s273_s0] sm:$0xff]  ;;  %v42_v10 = vld [vmem:[%s273_s0 + $0x8] sm:$0xff]  ;;  %v99_v19 = vld [vmem:[#allocation3] sm:$0xff]  ;;  %s196_s0 = smov [#allocation6]  }
   0xa   :  { %v139_v17 = vld [vmem:[%s275_s2] ss:$0 sm:$0xff]  ;;  %v100_v22 = vld [vmem:[#allocation3 + $0x8] sm:$0xff]  ;;  %s109_s16 = sshll.u32 %s196_s0, 4  ;;  %s110_s16 = int_to_ptr.vmem [resolvable:$true] %s109_s16 }
   0xb   :  { %70 = vmatpush.msra.mxu0 %v48_v3  ;;  %128 = vmatpush.msra.mxu1 %v48_v3 }
   0xd   :  { %71 = vmatpush.msra.mxu0 %v47_v4  ;;  %129 = vmatpush.msra.mxu1 %v47_v4 }
   0xe   :  { %v51_v11 = vld [vmem:[#allocation2] sm:$0xff] }
   0xf   :  { %72 = vmatpush.msra.mxu0 %v46_v5  ;;  %130 = vmatpush.msra.mxu1 %v46_v5  ;;  %v52_v12 = vld [vmem:[#allocation2 + $0x8] sm:$0xff] }
  0x11   :  { %73 = vmatpush.msra.mxu0 %v45_v6  ;;  %131 = vmatpush.msra.mxu1 %v45_v6 }
  0x13   :  { %74 = vmatpush.msra.mxu0 %v44_v7  ;;  %132 = vmatpush.msra.mxu1 %v44_v7 }
  0x15   :  { %75 = vmatpush.msra.mxu0 %v43_v8  ;;  %133 = vmatpush.msra.mxu1 %v43_v8 }
  0x16   :  { %124 = vmatmul.msk.f32.vlgmr.msra.gmra.mxu0 %vm53_vm1, %v41_v9  ;;  %125 = vmatmul.msk.f32.vlgmr.msra.gmra.mxu1 %vm53_vm1, %v42_v10 }
  0x93   :  { %v77_v13 = vpop.f32.mrf.mxu0  ;;  %v80_v14 = vpop.f32.mrf.mxu1 }
  0x94   :  { %v83_v15 = vadd.f32 %v77_v13, %v51_v11  ;;  %v84_v16 = vadd.f32 %v80_v14, %v52_v12 }
  0x96   :  { %86 = vst.msk [vmem:[#allocation2] sm:$0xff] %vm38_vm0, %v83_v15 }
  0x97   :  { %87 = vst.msk [vmem:[#allocation2 + $0x8] sm:$0xff] %vm38_vm0, %v84_v16 }
  0x9d   :  { %v91_v18 = vld [vmem:[#allocation2] sm:$0xff] }
  0x9e   :  { %v92_v20 = vld [vmem:[#allocation2 + $0x8] sm:$0xff]  ;;  %v97_v21 = vadd.f32 %v139_v17, %v91_v18 }
  0x9f   :  { %v98_v23 = vadd.f32 %v139_v17, %v92_v20 }
  0xa0   :  { %v101_v24 = vadd.f32 %v99_v19, %v97_v21 }
  0xa1   :  { %v102_v25 = vadd.f32 %v100_v22, %v98_v23 }
  0xa2   :  { %103 = vst.msk [vmem:[#allocation6] sm:$0xff] %vm38_vm0, %v101_v24 }
  0xa3   :  { %104 = vst.msk [vmem:[#allocation6 + $0x8] sm:$0xff] %vm38_vm0, %v102_v25 }
  0xa4   :  { %117 = dma.vmem_to_hbm [thread:$0]  %s110_s16, 256, %s112_s19, [#allocation5], %s193_s20, %s193_s20, %s194_s21  }
  0xa5   :  { %190 = dma.done.wait [#allocation5], 256  }
  0xa6   :  { %191 = vsyncadd [#allocation5], 4294967040 }
  0xa7   :  { %122 = vsyncpa [#allocation4], 1 }
  0xa8   :  { %123 = vsyncpa [#allocation5], 1 }

</bundles_post_ra>
